<compile_context>
chip_gen: v5e
topology: v5e:2x2
jax: 0.10.0
libtpu: 0.0.40
codegen_flags: <defaults>
</compile_context>

<pallas_src>
import numpy as np
import jax
import jax.numpy as jnp
from jax.experimental import pallas as pl
from jax.experimental.pallas import tpu as pltpu


# ----------------------------------------------------------------------------
# Fused forward kernel:
#   conv stack -> concat -> batchnorm -> merged attention heads -> linear+relu
# ----------------------------------------------------------------------------
def make_fused_kernel(n_layers, head_cnt, att_hidden, head_dims):
    def kernel(*refs):
        it = iter(refs)
        adj_ref = next(it)
        invdeg_ref = next(it)
        feat_ref = next(it)
        conv_refs = [(next(it), next(it)) for _ in range(n_layers)]
        gamma_ref = next(it)
        beta_ref = next(it)
        wa_ref = next(it)
        va_ref = next(it)
        wv_ref = next(it)
        mask_ref = next(it)
        outw_ref = next(it)
        outb_ref = next(it)
        o_ref = next(it)

        adj = adj_ref[...]                       # [N, N]
        inv_deg = invdeg_ref[...]                # [N, 1]

        # ---- graph-conv stack, all intermediates resident in VMEM ----
        h = feat_ref[...]                        # [N, F]
        cats = []
        for w_ref, b_ref in conv_refs:
            pooled = jnp.dot(adj, h, preferred_element_type=jnp.float32) + h
            lin = jnp.dot(pooled, w_ref[...],
                          preferred_element_type=jnp.float32) + b_ref[...]
            h = jnp.tanh(lin * inv_deg)          # multiply by precomputed 1/deg
            cats.append(h)
        cur = jnp.concatenate(cats, axis=-1)     # [N, dense_dim]

        # ---- BatchNorm1d (training-mode batch stats, biased variance) ----
        mean = jnp.mean(cur, axis=0, keepdims=True)
        var = jnp.mean(jnp.square(cur - mean), axis=0, keepdims=True)
        scale = gamma_ref[...] * jax.lax.rsqrt(var + 1e-5)   # fold gamma in
        cur = (cur - mean) * scale + beta_ref[...]

        # ---- merged multi-head additive attention pooling ----
        e = jnp.tanh(jnp.dot(cur, wa_ref[...],
                             preferred_element_type=jnp.float32))   # [N, H*A]
        ew = e * va_ref[...]                     # VPU mul (avoids [*,1] matmul)
        v_all = jnp.dot(cur, wv_ref[...],
                        preferred_element_type=jnp.float32)          # [N, dense]
        mask_t = mask_ref[...]                   # [N, G]; 1.0 if node in graph
        in_graph = mask_t > 0.0

        pooled_heads = []
        col = 0
        for hi in range(head_cnt):
            # per-head scores: lane reduce of e_h * va_h          -> [N, 1]
            s = jnp.sum(ew[:, hi * att_hidden:(hi + 1) * att_hidden],
                        axis=-1, keepdims=True)
            # segment-masked softmax over nodes of each graph     -> [N, G]
            masked = jnp.where(in_graph, s, jnp.float32(-1e30))
            m_g = jnp.max(masked, axis=0, keepdims=True)          # [1, G]
            p = jnp.where(in_graph, jnp.exp(s - m_g), 0.0)        # [N, G]
            denom = jnp.sum(p, axis=0, keepdims=True)             # [1, G]
            alpha_t = p / denom                                   # [N, G] = alpha^T
            # weighted pooling as a matmul: alpha^T @ V_h         -> [G, dh]
            dh = head_dims[hi]
            pooled_h = jax.lax.dot_general(
                alpha_t, v_all[:, col:col + dh],
                dimension_numbers=(((0,), (0,)), ((), ())),
                preferred_element_type=jnp.float32)
            pooled_heads.append(pooled_h)
            col += dh
        to_dense = jnp.concatenate(pooled_heads, axis=-1)         # [G, dense]

        # ---- output linear + ReLU (relu(relu(x)) == relu(x)) ----
        y = jnp.dot(to_dense, outw_ref[...],
                    preferred_element_type=jnp.float32) + outb_ref[...]
        o_ref[...] = jnp.maximum(y, 0.0)

    return kernel


def fast_multi_att_pool_forward(adj, node_degs, node_feat, params, g_cnt,
                                nodes_per_graph):
    n_layers = len(params["conv_w"])
    head_cnt = len(params["heads"])
    att_hidden = int(params["heads"][0]["wa"].shape[1])
    head_dims = tuple(int(hd["wv"].shape[1]) for hd in params["heads"])
    output_dim = int(params["out_w"].shape[1])

    # one-time, tiny wrapper-side preprocessing
    inv_degs = (1.0 / node_degs).astype(jnp.float32)                      # [N,1]
    wa_all = jnp.concatenate([hd["wa"] for hd in params["heads"]], axis=1)     # [D, H*A]
    va_all = jnp.concatenate([hd["va"].reshape(1, -1)
                              for hd in params["heads"]], axis=1)              # [1, H*A]
    wv_all = jnp.concatenate([hd["wv"] for hd in params["heads"]], axis=1)     # [D, dense]
    seg = jnp.repeat(jnp.arange(g_cnt, dtype=jnp.int32), nodes_per_graph)
    mask_t = (seg[:, None] ==
              jnp.arange(g_cnt, dtype=jnp.int32)[None, :]).astype(jnp.float32)  # [N, G]

    inputs = [adj, inv_degs, node_feat]
    for w, b in zip(params["conv_w"], params["conv_b"]):
        inputs += [w, b.reshape(1, -1)]
    inputs += [
        params["bn_gamma"].reshape(1, -1), params["bn_beta"].reshape(1, -1),
        wa_all, va_all, wv_all, mask_t,
        params["out_w"], params["out_b"].reshape(1, -1),
    ]

    in_specs = [pl.BlockSpec(tuple(x.shape), lambda i, nd=x.ndim: (0,) * nd)
                for x in inputs]

    kernel = make_fused_kernel(n_layers, head_cnt, att_hidden, head_dims)
    return pl.pallas_call(
        kernel,
        out_shape=jax.ShapeDtypeStruct((g_cnt, output_dim), jnp.float32),
        grid=(1,),
        in_specs=in_specs,
        out_specs=pl.BlockSpec((g_cnt, output_dim), lambda i: (0, 0)),
        compiler_params=pltpu.CompilerParams(
            dimension_semantics=("arbitrary",)),
    )(*inputs)


# ----------------------------------------------------------------------------
# Pure-JAX reference for correctness check
# ----------------------------------------------------------------------------
def reference_forward(adj, node_degs, node_feat, params, g_cnt, nodes_per_graph):
    h = node_feat
    cats = []
    for w, b in zip(params["conv_w"], params["conv_b"]):
        pooled = adj @ h + h
        lin = pooled @ w + b
        h = jnp.tanh(lin / node_degs)
        cats.append(h)
    cur = jnp.concatenate(cats, axis=1)
    mean = jnp.mean(cur, axis=0, keepdims=True)
    var = jnp.mean(jnp.square(cur - mean), axis=0, keepdims=True)
    cur = (cur - mean) / jnp.sqrt(var + 1e-5) * params["bn_gamma"] + params["bn_beta"]
    hg = cur.reshape(g_cnt, nodes_per_graph, -1)
    outs = []
    for hd in params["heads"]:
        e = jnp.tanh(hg @ hd["wa"])
        s = e @ hd["va"]
        alpha = jax.nn.softmax(s, axis=1)
        v = hg @ hd["wv"]
        outs.append(jnp.sum(alpha * v, axis=1))
    to_dense = jnp.concatenate(outs, axis=-1)
    y = to_dense @ params["out_w"] + params["out_b"]
    return jnp.maximum(y, 0.0)


# ----------------------------------------------------------------------------
# Deterministic parameter init + synthetic graphs
# ----------------------------------------------------------------------------
def init_params(key, num_node_feats, latent_dim, output_dim, head_cnt, att_hidden):
    dense_dim = sum(latent_dim)
    keys = iter(jax.random.split(key, 64))

    def lin(kin, kout):
        scale = 1.0 / np.sqrt(kin)
        w = jax.random.uniform(next(keys), (kin, kout), jnp.float32, -scale, scale)
        b = jax.random.uniform(next(keys), (kout,), jnp.float32, -scale, scale)
        return w, b

    conv_w, conv_b = [], []
    dims = [num_node_feats] + list(latent_dim)
    for i in range(len(latent_dim)):
        w, b = lin(dims[i], dims[i + 1])
        conv_w.append(w)
        conv_b.append(b)

    dim_func = lambda i: int((i + 1) * dense_dim / head_cnt) - int(i * dense_dim / head_cnt)
    heads = []
    for i in range(head_cnt):
        dh = dim_func(i)
        wa, _ = lin(dense_dim, att_hidden)
        va, _ = lin(att_hidden, 1)
        wv, _ = lin(dense_dim, dh)
        heads.append({"wa": wa, "va": va, "wv": wv})

    out_w, out_b = lin(dense_dim, output_dim)
    return {
        "conv_w": conv_w,
        "conv_b": conv_b,
        "bn_gamma": jnp.ones((dense_dim,), jnp.float32),
        "bn_beta": jnp.zeros((dense_dim,), jnp.float32),
        "heads": heads,
        "out_w": out_w,
        "out_b": out_b,
    }


def build_block_diag_ring(g_cnt, n):
    """Block-diagonal dense adjacency of G ring graphs with n nodes each."""
    a = np.zeros((g_cnt * n, g_cnt * n), dtype=np.float32)
    for g in range(g_cnt):
        off = g * n
        for i in range(n):
            a[off + i, off + (i + 1) % n] = 1.0
            a[off + (i + 1) % n, off + i] = 1.0
    degs = a.sum(axis=1, keepdims=True)
    return a, degs + 1.0   # node_degs = degs + 1 (as in the PyTorch forward)


if __name__ == "__main__":
    # Small config consistent with the module defaults
    num_node_feats = 8
    latent_dim = [32, 32, 32, 1]           # total_latent_dim = 97
    output_dim = 16
    head_cnt = 2
    att_hidden = 32
    g_cnt, nodes_per_graph = 2, 8          # 2 graphs, 8 nodes each -> N = 16

    key = jax.random.PRNGKey(0)
    k_feat, k_param = jax.random.split(key)

    adj_np, node_degs_np = build_block_diag_ring(g_cnt, nodes_per_graph)
    adj = jnp.asarray(adj_np)
    node_degs = jnp.asarray(node_degs_np)
    node_feat = jax.random.normal(
        k_feat, (g_cnt * nodes_per_graph, num_node_feats), jnp.float32)

    params = init_params(k_param, num_node_feats, latent_dim, output_dim,
                         head_cnt, att_hidden)

    out = fast_multi_att_pool_forward(adj, node_degs, node_feat, params,
                                      g_cnt, nodes_per_graph)
    out = jax.block_until_ready(out)

    ref = jax.block_until_ready(
        reference_forward(adj, node_degs, node_feat, params, g_cnt, nodes_per_graph))
    np.testing.assert_allclose(np.asarray(out), np.asarray(ref),
                               rtol=5e-2, atol=5e-2)

    assert out.shape == (g_cnt, output_dim)
    print("KERNEL_OK")
</pallas_src>

<mosaic_0001>
module attributes {stable_mosaic.version = 11 : i64} {
  func.func @kernel(%arg0: i32, %arg1: memref<16x16xf32, #tpu.memory_space<vmem>>, %arg2: memref<16x1xf32, #tpu.memory_space<vmem>>, %arg3: memref<16x8xf32, #tpu.memory_space<vmem>>, %arg4: memref<8x32xf32, #tpu.memory_space<vmem>>, %arg5: memref<1x32xf32, #tpu.memory_space<vmem>>, %arg6: memref<32x32xf32, #tpu.memory_space<vmem>>, %arg7: memref<1x32xf32, #tpu.memory_space<vmem>>, %arg8: memref<32x32xf32, #tpu.memory_space<vmem>>, %arg9: memref<1x32xf32, #tpu.memory_space<vmem>>, %arg10: memref<32x1xf32, #tpu.memory_space<vmem>>, %arg11: memref<1x1xf32, #tpu.memory_space<vmem>>, %arg12: memref<1x97xf32, #tpu.memory_space<vmem>>, %arg13: memref<1x97xf32, #tpu.memory_space<vmem>>, %arg14: memref<97x64xf32, #tpu.memory_space<vmem>>, %arg15: memref<1x64xf32, #tpu.memory_space<vmem>>, %arg16: memref<97x97xf32, #tpu.memory_space<vmem>>, %arg17: memref<16x2xf32, #tpu.memory_space<vmem>>, %arg18: memref<97x16xf32, #tpu.memory_space<vmem>>, %arg19: memref<1x16xf32, #tpu.memory_space<vmem>>, %arg20: memref<2x16xf32, #tpu.memory_space<vmem>>) attributes {dimension_semantics = [#tpu.dimension_semantics<arbitrary>], iteration_bounds = array<i64: 1>, scalar_prefetch = 0 : i64, scratch_operands = 0 : i64, tpu.core_type = #tpu.core_type<tc>, window_params = [{pipeline_mode = #tpu.pipeline_mode<synchronous>, transform_indices = @transform_0, window_bounds = array<i64: 16, 16>}, {pipeline_mode = #tpu.pipeline_mode<synchronous>, transform_indices = @transform_1, window_bounds = array<i64: 16, 1>}, {pipeline_mode = #tpu.pipeline_mode<synchronous>, transform_indices = @transform_2, window_bounds = array<i64: 16, 8>}, {pipeline_mode = #tpu.pipeline_mode<synchronous>, transform_indices = @transform_3, window_bounds = array<i64: 8, 32>}, {pipeline_mode = #tpu.pipeline_mode<synchronous>, transform_indices = @transform_4, window_bounds = array<i64: 1, 32>}, {pipeline_mode = #tpu.pipeline_mode<synchronous>, transform_indices = @transform_5, window_bounds = array<i64: 32, 32>}, {pipeline_mode = #tpu.pipeline_mode<synchronous>, transform_indices = @transform_6, window_bounds = array<i64: 1, 32>}, {pipeline_mode = #tpu.pipeline_mode<synchronous>, transform_indices = @transform_7, window_bounds = array<i64: 32, 32>}, {pipeline_mode = #tpu.pipeline_mode<synchronous>, transform_indices = @transform_8, window_bounds = array<i64: 1, 32>}, {pipeline_mode = #tpu.pipeline_mode<synchronous>, transform_indices = @transform_9, window_bounds = array<i64: 32, 1>}, {pipeline_mode = #tpu.pipeline_mode<synchronous>, transform_indices = @transform_10, window_bounds = array<i64: 1, 1>}, {pipeline_mode = #tpu.pipeline_mode<synchronous>, transform_indices = @transform_11, window_bounds = array<i64: 1, 97>}, {pipeline_mode = #tpu.pipeline_mode<synchronous>, transform_indices = @transform_12, window_bounds = array<i64: 1, 97>}, {pipeline_mode = #tpu.pipeline_mode<synchronous>, transform_indices = @transform_13, window_bounds = array<i64: 97, 64>}, {pipeline_mode = #tpu.pipeline_mode<synchronous>, transform_indices = @transform_14, window_bounds = array<i64: 1, 64>}, {pipeline_mode = #tpu.pipeline_mode<synchronous>, transform_indices = @transform_15, window_bounds = array<i64: 97, 97>}, {pipeline_mode = #tpu.pipeline_mode<synchronous>, transform_indices = @transform_16, window_bounds = array<i64: 16, 2>}, {pipeline_mode = #tpu.pipeline_mode<synchronous>, transform_indices = @transform_17, window_bounds = array<i64: 97, 16>}, {pipeline_mode = #tpu.pipeline_mode<synchronous>, transform_indices = @transform_18, window_bounds = array<i64: 1, 16>}, {pipeline_mode = #tpu.pipeline_mode<synchronous>, transform_indices = @transform_19, window_bounds = array<i64: 2, 16>}]} {
    %c0 = arith.constant 0 : index
    %c0_0 = arith.constant 0 : index
    %0 = vector.load %arg1[%c0, %c0_0] : memref<16x16xf32, #tpu.memory_space<vmem>>, vector<16x16xf32>
    %c0_1 = arith.constant 0 : index
    %c0_2 = arith.constant 0 : index
    %1 = vector.load %arg2[%c0_1, %c0_2] : memref<16x1xf32, #tpu.memory_space<vmem>>, vector<16x1xf32>
    %c0_3 = arith.constant 0 : index
    %c0_4 = arith.constant 0 : index
    %2 = vector.load %arg3[%c0_3, %c0_4] : memref<16x8xf32, #tpu.memory_space<vmem>>, vector<16x8xf32>
    %cst = arith.constant dense<0.000000e+00> : vector<16x8xf32>
    %3 = tpu.matmul %0, %2, %cst {dimension_numbers = #tpu.dot_dimension_numbers<[1], [0], [0], [1], [0, 0, 1, 1], [], []>} : vector<16x16xf32>, vector<16x8xf32>, vector<16x8xf32> -> vector<16x8xf32>
    %4 = arith.addf %3, %2 : vector<16x8xf32>
    %c0_5 = arith.constant 0 : index
    %c0_6 = arith.constant 0 : index
    %5 = vector.load %arg4[%c0_5, %c0_6] : memref<8x32xf32, #tpu.memory_space<vmem>>, vector<8x32xf32>
    %cst_7 = arith.constant dense<0.000000e+00> : vector<16x32xf32>
    %6 = tpu.matmul %4, %5, %cst_7 {dimension_numbers = #tpu.dot_dimension_numbers<[1], [0], [0], [1], [0, 0, 1, 1], [], []>} : vector<16x8xf32>, vector<8x32xf32>, vector<16x32xf32> -> vector<16x32xf32>
    %c0_8 = arith.constant 0 : index
    %c0_9 = arith.constant 0 : index
    %7 = vector.load %arg5[%c0_8, %c0_9] : memref<1x32xf32, #tpu.memory_space<vmem>>, vector<1x32xf32>
    %8 = vector.broadcast %7 : vector<1x32xf32> to vector<16x32xf32>
    %9 = arith.addf %6, %8 : vector<16x32xf32>
    %10 = vector.broadcast %1 : vector<16x1xf32> to vector<16x32xf32>
    %11 = arith.mulf %9, %10 : vector<16x32xf32>
    %12 = math.tanh %11 : vector<16x32xf32>
    %cst_10 = arith.constant dense<0.000000e+00> : vector<16x32xf32>
    %13 = tpu.matmul %0, %12, %cst_10 {dimension_numbers = #tpu.dot_dimension_numbers<[1], [0], [0], [1], [0, 0, 1, 1], [], []>} : vector<16x16xf32>, vector<16x32xf32>, vector<16x32xf32> -> vector<16x32xf32>
    %14 = arith.addf %13, %12 : vector<16x32xf32>
    %c0_11 = arith.constant 0 : index
    %c0_12 = arith.constant 0 : index
    %15 = vector.load %arg6[%c0_11, %c0_12] : memref<32x32xf32, #tpu.memory_space<vmem>>, vector<32x32xf32>
    %cst_13 = arith.constant dense<0.000000e+00> : vector<16x32xf32>
    %16 = tpu.matmul %14, %15, %cst_13 {dimension_numbers = #tpu.dot_dimension_numbers<[1], [0], [0], [1], [0, 0, 1, 1], [], []>} : vector<16x32xf32>, vector<32x32xf32>, vector<16x32xf32> -> vector<16x32xf32>
    %c0_14 = arith.constant 0 : index
    %c0_15 = arith.constant 0 : index
    %17 = vector.load %arg7[%c0_14, %c0_15] : memref<1x32xf32, #tpu.memory_space<vmem>>, vector<1x32xf32>
    %18 = vector.broadcast %17 : vector<1x32xf32> to vector<16x32xf32>
    %19 = arith.addf %16, %18 : vector<16x32xf32>
    %20 = vector.broadcast %1 : vector<16x1xf32> to vector<16x32xf32>
    %21 = arith.mulf %19, %20 : vector<16x32xf32>
    %22 = math.tanh %21 : vector<16x32xf32>
    %cst_16 = arith.constant dense<0.000000e+00> : vector<16x32xf32>
    %23 = tpu.matmul %0, %22, %cst_16 {dimension_numbers = #tpu.dot_dimension_numbers<[1], [0], [0], [1], [0, 0, 1, 1], [], []>} : vector<16x16xf32>, vector<16x32xf32>, vector<16x32xf32> -> vector<16x32xf32>
    %24 = arith.addf %23, %22 : vector<16x32xf32>
    %c0_17 = arith.constant 0 : index
    %c0_18 = arith.constant 0 : index
    %25 = vector.load %arg8[%c0_17, %c0_18] : memref<32x32xf32, #tpu.memory_space<vmem>>, vector<32x32xf32>
    %cst_19 = arith.constant dense<0.000000e+00> : vector<16x32xf32>
    %26 = tpu.matmul %24, %25, %cst_19 {dimension_numbers = #tpu.dot_dimension_numbers<[1], [0], [0], [1], [0, 0, 1, 1], [], []>} : vector<16x32xf32>, vector<32x32xf32>, vector<16x32xf32> -> vector<16x32xf32>
    %c0_20 = arith.constant 0 : index
    %c0_21 = arith.constant 0 : index
    %27 = vector.load %arg9[%c0_20, %c0_21] : memref<1x32xf32, #tpu.memory_space<vmem>>, vector<1x32xf32>
    %28 = vector.broadcast %27 : vector<1x32xf32> to vector<16x32xf32>
    %29 = arith.addf %26, %28 : vector<16x32xf32>
    %30 = vector.broadcast %1 : vector<16x1xf32> to vector<16x32xf32>
    %31 = arith.mulf %29, %30 : vector<16x32xf32>
    %32 = math.tanh %31 : vector<16x32xf32>
    %cst_22 = arith.constant dense<0.000000e+00> : vector<16x32xf32>
    %33 = tpu.matmul %0, %32, %cst_22 {dimension_numbers = #tpu.dot_dimension_numbers<[1], [0], [0], [1], [0, 0, 1, 1], [], []>} : vector<16x16xf32>, vector<16x32xf32>, vector<16x32xf32> -> vector<16x32xf32>
    %34 = arith.addf %33, %32 : vector<16x32xf32>
    %c0_23 = arith.constant 0 : index
    %c0_24 = arith.constant 0 : index
    %35 = vector.load %arg10[%c0_23, %c0_24] : memref<32x1xf32, #tpu.memory_space<vmem>>, vector<32x1xf32>
    %cst_25 = arith.constant dense<0.000000e+00> : vector<16x1xf32>
    %36 = tpu.matmul %34, %35, %cst_25 {dimension_numbers = #tpu.dot_dimension_numbers<[1], [0], [0], [1], [0, 0, 1, 1], [], []>} : vector<16x32xf32>, vector<32x1xf32>, vector<16x1xf32> -> vector<16x1xf32>
    %c0_26 = arith.constant 0 : index
    %c0_27 = arith.constant 0 : index
    %37 = vector.load %arg11[%c0_26, %c0_27] : memref<1x1xf32, #tpu.memory_space<vmem>>, vector<1x1xf32>
    %38 = vector.broadcast %37 : vector<1x1xf32> to vector<16x1xf32>
    %39 = arith.addf %36, %38 : vector<16x1xf32>
    %40 = arith.mulf %39, %1 : vector<16x1xf32>
    %41 = math.tanh %40 : vector<16x1xf32>
    %42 = tpu.concatenate %12, %22, %32, %41 in 1 : vector<16x32xf32>, vector<16x32xf32>, vector<16x32xf32>, vector<16x1xf32> -> vector<16x97xf32>
    %cst_28 = arith.constant dense<0.000000e+00> : vector<97xf32>
    %43 = vector.multi_reduction <add>, %42, %cst_28 [0] : vector<16x97xf32> to vector<97xf32>
    %44 = vector.shape_cast %43 : vector<97xf32> to vector<1x97xf32>
    %cst_29 = arith.constant 1.600000e+01 : f32
    %45 = vector.broadcast %cst_29 : f32 to vector<1x97xf32>
    %46 = arith.divf %44, %45 : vector<1x97xf32>
    %47 = vector.broadcast %46 : vector<1x97xf32> to vector<16x97xf32>
    %48 = arith.subf %42, %47 : vector<16x97xf32>
    %49 = arith.mulf %48, %48 : vector<16x97xf32>
    %cst_30 = arith.constant dense<0.000000e+00> : vector<97xf32>
    %50 = vector.multi_reduction <add>, %49, %cst_30 [0] : vector<16x97xf32> to vector<97xf32>
    %51 = vector.shape_cast %50 : vector<97xf32> to vector<1x97xf32>
    %cst_31 = arith.constant 1.600000e+01 : f32
    %52 = vector.broadcast %cst_31 : f32 to vector<1x97xf32>
    %53 = arith.divf %51, %52 : vector<1x97xf32>
    %c0_32 = arith.constant 0 : index
    %c0_33 = arith.constant 0 : index
    %54 = vector.load %arg12[%c0_32, %c0_33] : memref<1x97xf32, #tpu.memory_space<vmem>>, vector<1x97xf32>
    %cst_34 = arith.constant 9.99999974E-6 : f32
    %55 = vector.broadcast %cst_34 : f32 to vector<1x97xf32>
    %56 = arith.addf %53, %55 : vector<1x97xf32>
    %57 = math.rsqrt %56 : vector<1x97xf32>
    %58 = arith.mulf %54, %57 : vector<1x97xf32>
    %59 = vector.broadcast %46 : vector<1x97xf32> to vector<16x97xf32>
    %60 = arith.subf %42, %59 : vector<16x97xf32>
    %61 = vector.broadcast %58 : vector<1x97xf32> to vector<16x97xf32>
    %62 = arith.mulf %60, %61 : vector<16x97xf32>
    %c0_35 = arith.constant 0 : index
    %c0_36 = arith.constant 0 : index
    %63 = vector.load %arg13[%c0_35, %c0_36] : memref<1x97xf32, #tpu.memory_space<vmem>>, vector<1x97xf32>
    %64 = vector.broadcast %63 : vector<1x97xf32> to vector<16x97xf32>
    %65 = arith.addf %62, %64 : vector<16x97xf32>
    %c0_37 = arith.constant 0 : index
    %c0_38 = arith.constant 0 : index
    %66 = vector.load %arg14[%c0_37, %c0_38] : memref<97x64xf32, #tpu.memory_space<vmem>>, vector<97x64xf32>
    %cst_39 = arith.constant dense<0.000000e+00> : vector<16x64xf32>
    %67 = tpu.matmul %65, %66, %cst_39 {dimension_numbers = #tpu.dot_dimension_numbers<[1], [0], [0], [1], [0, 0, 1, 1], [], []>} : vector<16x97xf32>, vector<97x64xf32>, vector<16x64xf32> -> vector<16x64xf32>
    %68 = math.tanh %67 : vector<16x64xf32>
    %c0_40 = arith.constant 0 : index
    %c0_41 = arith.constant 0 : index
    %69 = vector.load %arg15[%c0_40, %c0_41] : memref<1x64xf32, #tpu.memory_space<vmem>>, vector<1x64xf32>
    %70 = vector.broadcast %69 : vector<1x64xf32> to vector<16x64xf32>
    %71 = arith.mulf %68, %70 : vector<16x64xf32>
    %c0_42 = arith.constant 0 : index
    %c0_43 = arith.constant 0 : index
    %72 = vector.load %arg16[%c0_42, %c0_43] : memref<97x97xf32, #tpu.memory_space<vmem>>, vector<97x97xf32>
    %cst_44 = arith.constant dense<0.000000e+00> : vector<16x97xf32>
    %73 = tpu.matmul %65, %72, %cst_44 {dimension_numbers = #tpu.dot_dimension_numbers<[1], [0], [0], [1], [0, 0, 1, 1], [], []>} : vector<16x97xf32>, vector<97x97xf32>, vector<16x97xf32> -> vector<16x97xf32>
    %c0_45 = arith.constant 0 : index
    %c0_46 = arith.constant 0 : index
    %74 = vector.load %arg17[%c0_45, %c0_46] : memref<16x2xf32, #tpu.memory_space<vmem>>, vector<16x2xf32>
    %cst_47 = arith.constant 0.000000e+00 : f32
    %75 = vector.broadcast %cst_47 : f32 to vector<16x2xf32>
    %76 = arith.cmpf ogt, %74, %75 : vector<16x2xf32>
    %77 = vector.extract_strided_slice %71 {offsets = [0, 0], sizes = [16, 32], strides = [1, 1]} : vector<16x64xf32> to vector<16x32xf32>
    %cst_48 = arith.constant dense<0.000000e+00> : vector<16xf32>
    %78 = vector.multi_reduction <add>, %77, %cst_48 [1] : vector<16x32xf32> to vector<16xf32>
    %79 = vector.shape_cast %78 : vector<16xf32> to vector<16x1xf32>
    %cst_49 = arith.constant -1.000000e+30 : f32
    %80 = vector.shape_cast %79 : vector<16x1xf32> to vector<16x1xf32>
    %81 = vector.broadcast %80 : vector<16x1xf32> to vector<16x2xf32>
    %82 = vector.broadcast %cst_49 : f32 to vector<16x2xf32>
    %83 = arith.select %76, %81, %82 : vector<16x2xi1>, vector<16x2xf32>
    %cst_50 = arith.constant dense<0xFF800000> : vector<2xf32>
    %84 = vector.multi_reduction <maximumf>, %83, %cst_50 [0] : vector<16x2xf32> to vector<2xf32>
    %85 = vector.shape_cast %84 : vector<2xf32> to vector<1x2xf32>
    %86 = vector.broadcast %79 : vector<16x1xf32> to vector<16x2xf32>
    %87 = vector.broadcast %85 : vector<1x2xf32> to vector<16x2xf32>
    %88 = arith.subf %86, %87 : vector<16x2xf32>
    %89 = math.exp %88 : vector<16x2xf32>
    %cst_51 = arith.constant 0.000000e+00 : f32
    %90 = vector.broadcast %cst_51 : f32 to vector<16x2xf32>
    %91 = arith.select %76, %89, %90 : vector<16x2xi1>, vector<16x2xf32>
    %cst_52 = arith.constant dense<0.000000e+00> : vector<2xf32>
    %92 = vector.multi_reduction <add>, %91, %cst_52 [0] : vector<16x2xf32> to vector<2xf32>
    %93 = vector.shape_cast %92 : vector<2xf32> to vector<1x2xf32>
    %94 = vector.broadcast %93 : vector<1x2xf32> to vector<16x2xf32>
    %95 = arith.divf %91, %94 : vector<16x2xf32>
    %96 = vector.extract_strided_slice %73 {offsets = [0, 0], sizes = [16, 48], strides = [1, 1]} : vector<16x97xf32> to vector<16x48xf32>
    %cst_53 = arith.constant dense<0.000000e+00> : vector<2x48xf32>
    %97 = tpu.matmul %95, %96, %cst_53 {dimension_numbers = #tpu.dot_dimension_numbers<[0], [0], [1], [1], [0, 1, 1, 1], [], []>} : vector<16x2xf32>, vector<16x48xf32>, vector<2x48xf32> -> vector<2x48xf32>
    %98 = vector.extract_strided_slice %71 {offsets = [0, 32], sizes = [16, 32], strides = [1, 1]} : vector<16x64xf32> to vector<16x32xf32>
    %cst_54 = arith.constant dense<0.000000e+00> : vector<16xf32>
    %99 = vector.multi_reduction <add>, %98, %cst_54 [1] : vector<16x32xf32> to vector<16xf32>
    %100 = vector.shape_cast %99 : vector<16xf32> to vector<16x1xf32>
    %cst_55 = arith.constant -1.000000e+30 : f32
    %101 = vector.shape_cast %100 : vector<16x1xf32> to vector<16x1xf32>
    %102 = vector.broadcast %101 : vector<16x1xf32> to vector<16x2xf32>
    %103 = vector.broadcast %cst_55 : f32 to vector<16x2xf32>
    %104 = arith.select %76, %102, %103 : vector<16x2xi1>, vector<16x2xf32>
    %cst_56 = arith.constant dense<0xFF800000> : vector<2xf32>
    %105 = vector.multi_reduction <maximumf>, %104, %cst_56 [0] : vector<16x2xf32> to vector<2xf32>
    %106 = vector.shape_cast %105 : vector<2xf32> to vector<1x2xf32>
    %107 = vector.broadcast %100 : vector<16x1xf32> to vector<16x2xf32>
    %108 = vector.broadcast %106 : vector<1x2xf32> to vector<16x2xf32>
    %109 = arith.subf %107, %108 : vector<16x2xf32>
    %110 = math.exp %109 : vector<16x2xf32>
    %cst_57 = arith.constant 0.000000e+00 : f32
    %111 = vector.broadcast %cst_57 : f32 to vector<16x2xf32>
    %112 = arith.select %76, %110, %111 : vector<16x2xi1>, vector<16x2xf32>
    %cst_58 = arith.constant dense<0.000000e+00> : vector<2xf32>
    %113 = vector.multi_reduction <add>, %112, %cst_58 [0] : vector<16x2xf32> to vector<2xf32>
    %114 = vector.shape_cast %113 : vector<2xf32> to vector<1x2xf32>
    %115 = vector.broadcast %114 : vector<1x2xf32> to vector<16x2xf32>
    %116 = arith.divf %112, %115 : vector<16x2xf32>
    %117 = vector.extract_strided_slice %73 {offsets = [0, 48], sizes = [16, 49], strides = [1, 1]} : vector<16x97xf32> to vector<16x49xf32>
    %cst_59 = arith.constant dense<0.000000e+00> : vector<2x49xf32>
    %118 = tpu.matmul %116, %117, %cst_59 {dimension_numbers = #tpu.dot_dimension_numbers<[0], [0], [1], [1], [0, 1, 1, 1], [], []>} : vector<16x2xf32>, vector<16x49xf32>, vector<2x49xf32> -> vector<2x49xf32>
    %119 = tpu.concatenate %97, %118 in 1 : vector<2x48xf32>, vector<2x49xf32> -> vector<2x97xf32>
    %c0_60 = arith.constant 0 : index
    %c0_61 = arith.constant 0 : index
    %120 = vector.load %arg18[%c0_60, %c0_61] : memref<97x16xf32, #tpu.memory_space<vmem>>, vector<97x16xf32>
    %cst_62 = arith.constant dense<0.000000e+00> : vector<2x16xf32>
    %121 = tpu.matmul %119, %120, %cst_62 {dimension_numbers = #tpu.dot_dimension_numbers<[1], [0], [0], [1], [0, 0, 1, 1], [], []>} : vector<2x97xf32>, vector<97x16xf32>, vector<2x16xf32> -> vector<2x16xf32>
    %c0_63 = arith.constant 0 : index
    %c0_64 = arith.constant 0 : index
    %122 = vector.load %arg19[%c0_63, %c0_64] : memref<1x16xf32, #tpu.memory_space<vmem>>, vector<1x16xf32>
    %123 = vector.broadcast %122 : vector<1x16xf32> to vector<2x16xf32>
    %124 = arith.addf %121, %123 : vector<2x16xf32>
    %cst_65 = arith.constant 0.000000e+00 : f32
    %125 = vector.broadcast %cst_65 : f32 to vector<2x16xf32>
    %126 = arith.maximumf %124, %125 : vector<2x16xf32>
    %c0_66 = arith.constant 0 : index
    %c0_67 = arith.constant 0 : index
    %127 = vector.load %arg20[%c0_66, %c0_67] : memref<2x16xf32, #tpu.memory_space<vmem>>, vector<2x16xf32>
    tpu.vector_store %arg20[%c0_66, %c0_67], %126 {strides = array<i32>} : memref<2x16xf32, #tpu.memory_space<vmem>>, vector<2x16xf32>,
    return
  }
  func.func @transform_0(%arg0: i32) -> (i32, i32) {
    %c0_i32 = arith.constant 0 : i32
    %c0_i32_0 = arith.constant 0 : i32
    %c0_i32_1 = arith.constant 0 : i32
    return %c0_i32, %c0_i32_0 : i32, i32
  }
  func.func @transform_1(%arg0: i32) -> (i32, i32) {
    %c0_i32 = arith.constant 0 : i32
    %c0_i32_0 = arith.constant 0 : i32
    %c0_i32_1 = arith.constant 0 : i32
    return %c0_i32, %c0_i32_0 : i32, i32
  }
  func.func @transform_2(%arg0: i32) -> (i32, i32) {
    %c0_i32 = arith.constant 0 : i32
    %c0_i32_0 = arith.constant 0 : i32
    %c0_i32_1 = arith.constant 0 : i32
    return %c0_i32, %c0_i32_0 : i32, i32
  }
  func.func @transform_3(%arg0: i32) -> (i32, i32) {
    %c0_i32 = arith.constant 0 : i32
    %c0_i32_0 = arith.constant 0 : i32
    %c0_i32_1 = arith.constant 0 : i32
    return %c0_i32, %c0_i32_0 : i32, i32
  }
  func.func @transform_4(%arg0: i32) -> (i32, i32) {
    %c0_i32 = arith.constant 0 : i32
    %c0_i32_0 = arith.constant 0 : i32
    %c0_i32_1 = arith.constant 0 : i32
    return %c0_i32, %c0_i32_0 : i32, i32
  }
  func.func @transform_5(%arg0: i32) -> (i32, i32) {
    %c0_i32 = arith.constant 0 : i32
    %c0_i32_0 = arith.constant 0 : i32
    %c0_i32_1 = arith.constant 0 : i32
    return %c0_i32, %c0_i32_0 : i32, i32
  }
  func.func @transform_6(%arg0: i32) -> (i32, i32) {
    %c0_i32 = arith.constant 0 : i32
    %c0_i32_0 = arith.constant 0 : i32
    %c0_i32_1 = arith.constant 0 : i32
    return %c0_i32, %c0_i32_0 : i32, i32
  }
  func.func @transform_7(%arg0: i32) -> (i32, i32) {
    %c0_i32 = arith.constant 0 : i32
    %c0_i32_0 = arith.constant 0 : i32
    %c0_i32_1 = arith.constant 0 : i32
    return %c0_i32, %c0_i32_0 : i32, i32
  }
  func.func @transform_8(%arg0: i32) -> (i32, i32) {
    %c0_i32 = arith.constant 0 : i32
    %c0_i32_0 = arith.constant 0 : i32
    %c0_i32_1 = arith.constant 0 : i32
    return %c0_i32, %c0_i32_0 : i32, i32
  }
  func.func @transform_9(%arg0: i32) -> (i32, i32) {
    %c0_i32 = arith.constant 0 : i32
    %c0_i32_0 = arith.constant 0 : i32
    %c0_i32_1 = arith.constant 0 : i32
    return %c0_i32, %c0_i32_0 : i32, i32
  }
  func.func @transform_10(%arg0: i32) -> (i32, i32) {
    %c0_i32 = arith.constant 0 : i32
    %c0_i32_0 = arith.constant 0 : i32
    %c0_i32_1 = arith.constant 0 : i32
    return %c0_i32, %c0_i32_0 : i32, i32
  }
  func.func @transform_11(%arg0: i32) -> (i32, i32) {
    %c0_i32 = arith.constant 0 : i32
    %c0_i32_0 = arith.constant 0 : i32
    %c0_i32_1 = arith.constant 0 : i32
    return %c0_i32, %c0_i32_0 : i32, i32
  }
  func.func @transform_12(%arg0: i32) -> (i32, i32) {
    %c0_i32 = arith.constant 0 : i32
    %c0_i32_0 = arith.constant 0 : i32
    %c0_i32_1 = arith.constant 0 : i32
    return %c0_i32, %c0_i32_0 : i32, i32
  }
  func.func @transform_13(%arg0: i32) -> (i32, i32) {
    %c0_i32 = arith.constant 0 : i32
    %c0_i32_0 = arith.constant 0 : i32
    %c0_i32_1 = arith.constant 0 : i32
    return %c0_i32, %c0_i32_0 : i32, i32
  }
  func.func @transform_14(%arg0: i32) -> (i32, i32) {
    %c0_i32 = arith.constant 0 : i32
    %c0_i32_0 = arith.constant 0 : i32
    %c0_i32_1 = arith.constant 0 : i32
    return %c0_i32, %c0_i32_0 : i32, i32
  }
  func.func @transform_15(%arg0: i32) -> (i32, i32) {
    %c0_i32 = arith.constant 0 : i32
    %c0_i32_0 = arith.constant 0 : i32
    %c0_i32_1 = arith.constant 0 : i32
    return %c0_i32, %c0_i32_0 : i32, i32
  }
  func.func @transform_16(%arg0: i32) -> (i32, i32) {
    %c0_i32 = arith.constant 0 : i32
    %c0_i32_0 = arith.constant 0 : i32
    %c0_i32_1 = arith.constant 0 : i32
    return %c0_i32, %c0_i32_0 : i32, i32
  }
  func.func @transform_17(%arg0: i32) -> (i32, i32) {
    %c0_i32 = arith.constant 0 : i32
    %c0_i32_0 = arith.constant 0 : i32
    %c0_i32_1 = arith.constant 0 : i32
    return %c0_i32, %c0_i32_0 : i32, i32
  }
  func.func @transform_18(%arg0: i32) -> (i32, i32) {
    %c0_i32 = arith.constant 0 : i32
    %c0_i32_0 = arith.constant 0 : i32
    %c0_i32_1 = arith.constant 0 : i32
    return %c0_i32, %c0_i32_0 : i32, i32
  }
  func.func @transform_19(%arg0: i32) -> (i32, i32) {
    %c0_i32 = arith.constant 0 : i32
    %c0_i32_0 = arith.constant 0 : i32
    %c0_i32_1 = arith.constant 0 : i32
    return %c0_i32, %c0_i32_0 : i32, i32
  }
}

</mosaic_0001>

<bundles_post_ra>
// kernel: tpu_custom_call.1
= control target key start
LH: loop header
LB: loop body
LE: loop exit
PB: predicated region body
PF: predicated region fallthrough
CT: control target
= control target key end

     0   :  { %s1361_s0 = inlined_call_operand.vmem [shape: f32[16,16], index: 0, kind: input, shape index: {}]   ;;  %s1362_s1 = inlined_call_operand.vmem [shape: f32[16,1], index: 1, kind: input, shape index: {}]   ;;  %s1363_s2 = inlined_call_operand.vmem [shape: f32[16,8], index: 2, kind: input, shape index: {}]   ;;  %s1364_s3 = inlined_call_operand.vmem [shape: f32[8,32], index: 3, kind: input, shape index: {}]   ;;  %s1365_s4 = inlined_call_operand.vmem [shape: f32[1,32], index: 4, kind: input, shape index: {}]   ;;  %s1366_s5 = inlined_call_operand.vmem [shape: f32[32,32], index: 5, kind: input, shape index: {}]   ;;  %s1367_s6 = inlined_call_operand.vmem [shape: f32[1,32], index: 6, kind: input, shape index: {}]   ;;  %s1368_s7 = inlined_call_operand.vmem [shape: f32[32,32], index: 7, kind: input, shape index: {}]   ;;  %s1369_s8 = inlined_call_operand.vmem [shape: f32[1,32], index: 8, kind: input, shape index: {}]   ;;  %s1370_s9 = inlined_call_operand.vmem [shape: f32[32,1], index: 9, kind: input, shape index: {}]   ;;  %s1371_s10 = inlined_call_operand.<no memory space> [shape: f32[1,1], index: 10, kind: input, shape index: {}]   ;;  %s1372_s11 = inlined_call_operand.vmem [shape: f32[1,97], index: 11, kind: input, shape index: {}]   ;;  %s1373_s12 = inlined_call_operand.vmem [shape: f32[1,97], index: 12, kind: input, shape index: {}]   ;;  %s1374_s13 = inlined_call_operand.vmem [shape: f32[97,64], index: 13, kind: input, shape index: {}]   ;;  %s1375_s14 = inlined_call_operand.vmem [shape: f32[1,64], index: 14, kind: input, shape index: {}]   ;;  %s1376_s15 = inlined_call_operand.vmem [shape: f32[97,97], index: 15, kind: input, shape index: {}]   ;;  %s1377_s16 = inlined_call_operand.vmem [shape: f32[16,2], index: 16, kind: input, shape index: {}]   ;;  %s1378_s17 = inlined_call_operand.vmem [shape: f32[97,16], index: 17, kind: input, shape index: {}]   ;;  %s1379_s18 = inlined_call_operand.vmem [shape: f32[1,16], index: 18, kind: input, shape index: {}]   ;;  %s1380_s19 = inlined_call_operand.hbm [shape: f32[2,16], index: 19, kind: output, shape index: {}]  }
   0x1   :  { %1384 = sst [smem:[#allocation6_spill]] %s1361_s0  ;;  %v24_v0 = vstv %s1371_s10 }
   0x2   :  { %1385 = sst [smem:[#allocation7_spill]] %s1362_s1  ;;  %25 = vst [vmem:[#allocation2] sm:$0x1] %v24_v0 }
   0x3   :  { %1386 = sst [smem:[#allocation8_spill]] %s1363_s2 }
   0x4   :  { %1387 = sst [smem:[#allocation9_spill]] %s1364_s3 }
   0x5   :  { %s1388_s1 = sld [smem:[#allocation8_spill]]  ;;  %vm71_vm0 = vcmask 130048  }
   0x6   :  { %s1389_s25 = sld [smem:[#allocation6_spill]] }
   0xb   :  { %v70_v1 = vld [vmem:[%s1388_s1 + $0x8] sm:$0xff]  ;;  %v69_v2 = vld [vmem:[%s1388_s1] sm:$0xff] }
   0xc   :  { %92 = vmatpush.msra.mxu0 %v70_v1  ;;  %v1053_v3 = vld [vmem:[%s1389_s25] sm:$0xff] }
   0xe   :  { %93 = vmatpush.msra.mxu0 %v69_v2 }
   0xf   :  { %26 = vsyncpa [#allocation4], 0  ;;  %823 = vmatmul.msk.f32.vlgmr.msra.gmra.mxu0 %vm71_vm0, %v1053_v3  ;;  %v1060_v4 = vld [vmem:[%s1389_s25 + $0x8] sm:$0xff]  ;;  %s1390_s28 = sld [smem:[#allocation9_spill]]  ;;  %v933_v7 = vmov 0   ;;  %vm106_vm1 = vcmask 64512  }
  0x10   :  { %s1391_s30 = sld [smem:[#allocation7_spill]]  ;;  %858 = vset.pattern.permute.xlu0 %v933_v7  ;;  %v176_v14 = vld [vmem:[%s1366_s5 + $0x18] sm:$0xff]  ;;  %v175_v15 = vld [vmem:[%s1366_s5 + $0x10] sm:$0xff]  ;;  %v864_v17 = vld [vmem:[%s1365_s4] ss:$0 sm:$0xff]  ;;  %vm181_vm2 = vcmask 261120  }
  0x11   :  { %200 = vmatpush.msra.mxu3 %v176_v14  ;;  %v174_v26 = vld [vmem:[%s1366_s5 + $0x8] sm:$0xff]  ;;  %v173_v27 = vld [vmem:[%s1366_s5] sm:$0xff]  ;;  %s934_s5 = smov 32   ;;  %v241_v41 = vld [vmem:[%s1368_s7 + $0x18] sm:$0xff]  ;;  %vm369_vm3 = vcmask 523264   ;;  %vm372_vm4 = vcmask 785408  }
  0x12   :  { %v865_v32 = vld [vmem:[%s1367_s6] ss:$0 sm:$0xff]  ;;  %v240_v42 = vld [vmem:[%s1368_s7 + $0x10] sm:$0xff]  ;;  %264 = vmatpush.msrb.mxu0 %v241_v41  ;;  %v239_v43 = vld [vmem:[%s1368_s7 + $0x8] sm:$0xff]  ;;  %vm375_vm5 = vcmask 793600   ;;  %vm450_vm6 = vcmask 1040384  }
  0x13   :  { %201 = vmatpush.msra.mxu3 %v175_v15  ;;  %v238_v44 = vld [vmem:[%s1368_s7] sm:$0xff]  ;;  %s935_s7 = smov 64   ;;  %v305_v58 = vld [vmem:[%s1370_s9 + $0x18] sm:$0xff]  ;;  %v304_v59 = vld [vmem:[%s1370_s9 + $0x10] sm:$0xff]  ;;  %v937_v15 = vmov 16.0   ;;  %vm536_vm13 = vcmask 15360  }
  0x14   :  { %265 = vmatpush.msrb.mxu0 %v240_v42  ;;  %v866_v49 = vld [vmem:[%s1369_s8] ss:$0 sm:$0xff]  ;;  %v303_v60 = vld [vmem:[%s1370_s9 + $0x8] sm:$0xff]  ;;  %v441_v42 = vld [vmem:[%s1374_s13 + $0x50] sm:$0xff]  ;;  %s940_s25 = smov [#allocation3]   ;;  %s814_s26 = sshll.u32 %s1380_s19, 4  ;;  %s815_s26 = int_to_ptr.hbm [resolvable:$true] %s814_s26 }
  0x15   :  { %v101_v5 = vld [vmem:[%s1390_s28] sm:$0xff]  ;;  %202 = vmatpush.msra.mxu3 %v174_v26  ;;  %s812_s4 = sshll.u32 %s940_s25, 4  ;;  %s813_s4 = int_to_ptr.vmem [resolvable:$true] %s812_s4 }
  0x16   :  { %128 = vmatpush.msra.mxu1 %v101_v5  ;;  %v1070_v6 = vld [vmem:[%s1391_s30 + $0x8] sm:$0xff]  ;;  %v1076_v8 = vld [vmem:[%s1391_s30] sm:$0xff]  ;;  %266 = vmatpush.msrb.mxu0 %v239_v43  ;;  %v495_v43 = vld [vmem:[%s1376_s15 + $0x50] sm:$0xff] }
  0x17   :  { %824 = vmatmul.msk.f32.gmra.mxu0 %vm71_vm0, %v1060_v4  ;;  %143 = vperm.xlu0 %858, %v1070_v6   ;;  %v302_v61 = vld [vmem:[%s1370_s9] sm:$0xff]  ;;  %s936_s9 = smov 96  }
  0x18   :  { %203 = vmatpush.msra.mxu3 %v173_v27  ;;  %267 = vmatpush.msrb.mxu0 %v238_v44 }
  0x1a   :  { %328 = vmatpush.msrb.mxu3 %v305_v58 }
  0x1c   :  { %329 = vmatpush.msrb.mxu3 %v304_v59 }
  0x1e   :  { %330 = vmatpush.msrb.mxu3 %v303_v60 }
  0x1f   :  { %138 = vperm.xlu0 %858, %v1076_v8  }
  0x20   :  { %331 = vmatpush.msrb.mxu3 %v302_v61  ;;  %v436_v61 = vld [vmem:[%s1374_s13 + $0x28] sm:$0xff] }
  0x89   :  { %v1079_v13 = vpop.permute.xlu0 %143 }
  0x8c   :  { %v95_v9 = vpop.f32.mrf.mxu0 }
  0x8d   :  { %v96_v10 = vadd.f32 %v95_v9, %v69_v2  ;;  %v867_v2 = vld [vmem:[#allocation2] ss:$0 sm:$0xff] }
  0x8f   :  { %825 = vmatmul.msk.f32.vlgmr.msra.gmra.mxu1 %vm106_vm1, %v96_v10 }
  0x91   :  { %v139_v19 = vpop.permute.xlu0 %138 }
  0x94   :  { %v98_v11 = vpop.f32.mrf.mxu0 }
  0x95   :  { %v99_v12 = vadd.f32 %v98_v11, %v70_v1 }
  0x97   :  { %826 = vmatmul.msk.f32.gmra.mxu1 %vm106_vm1, %v99_v12 }
 0x10c   :  { %v130_v16 = vpop.f32.mrf.mxu1 }
 0x10d   :  { %v131_v18 = vadd.f32 %v864_v17, %v130_v16 }
 0x10f   :  { %v146_v22 = vmul.f32 %v139_v19, %v131_v18 }
 0x114   :  { %v133_v20 = vpop.f32.mrf.mxu1 }
 0x115   :  { %v134_v21 = vadd.f32 %v864_v17, %v133_v20 }
 0x117   :  { %v147_v23 = vmul.f32 %v1079_v13, %v134_v21 }
 0x119   :  { %871 = vtanh.f32 %v147_v23 }
 0x11a   :  { %873 = vtanh.f32 %v146_v22 }
 0x11f   :  { %v1091_v24 = vpop.eup %871 }
 0x120   :  { %164 = vmatpush.msra.mxu2 %v1091_v24  ;;  %v1094_v25 = vpop.eup %873 }
 0x122   :  { %165 = vmatpush.msra.mxu2 %v1094_v25 }
 0x123   :  { %827 = vmatmul.msk.f32.vlgmr.msra.gmra.mxu2 %vm71_vm0, %v1053_v3 }
 0x12b   :  { %828 = vmatmul.msk.f32.gmra.mxu2 %vm71_vm0, %v1060_v4 }
 0x1a6   :  { %v167_v28 = vpop.f32.mrf.mxu2 }
 0x1a7   :  { %v168_v29 = vadd.f32 %v1094_v25, %v167_v28 }
 0x1a9   :  { %829 = vmatmul.msk.f32.vlgmr.msra.gmra.mxu3 %vm181_vm2, %v168_v29 }
 0x1ae   :  { %v170_v30 = vpop.f32.mrf.mxu2 }
 0x1af   :  { %v171_v31 = vadd.f32 %v1091_v24, %v170_v30 }
 0x1b1   :  { %830 = vmatmul.msk.f32.gmra.mxu3 %vm181_vm2, %v171_v31 }
 0x22c   :  { %v205_v33 = vpop.f32.mrf.mxu3 }
 0x22d   :  { %v206_v34 = vadd.f32 %v865_v32, %v205_v33 }
 0x22f   :  { %v211_v35 = vmul.f32 %v206_v34, %v139_v19 }
 0x231   :  { %875 = vtanh.f32 %v211_v35 }
 0x234   :  { %v208_v36 = vpop.f32.mrf.mxu3 }
 0x235   :  { %v209_v37 = vadd.f32 %v865_v32, %v208_v36  ;;  %v497_v36 = vld [vmem:[%s1376_s15 + $0x60] sm:$0x1] }
 0x236   :  { %842 = vmatpush.msk.msra.mxu0 %vm450_vm6, %v497_v36 }
 0x237   :  { %v876_v38 = vpop.eup %875  ;;  %v212_v39 = vmul.f32 %v209_v37, %v1079_v13 }
 0x238   :  { %345 = vrot.lane.b32.xlu1 %v876_v38, %s934_s5 }
 0x239   :  { %877 = vtanh.f32 %v212_v39  ;;  %v496_v39 = vld [vmem:[%s1376_s15 + $0x58] sm:$0xff] }
 0x23a   :  { %505 = vmatpush.msra.mxu0 %v496_v39 }
 0x23c   :  { %506 = vmatpush.msra.mxu0 %v495_v43 }
 0x23f   :  { %v878_v40 = vpop.eup %877 }
 0x240   :  { %229 = vmatpush.msrb.mxu1 %v878_v40  ;;  %347 = vrot.lane.b32.xlu1 %v878_v40, %s934_s5 }
 0x242   :  { %230 = vmatpush.msrb.mxu1 %v876_v38 }
 0x243   :  { %831 = vmatmul.msk.f32.vlgmr.msrb.gmra.mxu1 %vm71_vm0, %v1053_v3 }
 0x24b   :  { %832 = vmatmul.msk.f32.gmra.mxu1 %vm71_vm0, %v1060_v4 }
 0x2c0   :  { %v232_v45 = vpop.f32.mrf.mxu1 }
 0x2c1   :  { %v233_v46 = vadd.f32 %v876_v38, %v232_v45  ;;  %v442_v38 = vld [vmem:[%s1374_s13 + $0x58] sm:$0xff]  ;;  %v440_v45 = vld [vmem:[%s1374_s13 + $0x48] sm:$0xff] }
 0x2c3   :  { %833 = vmatmul.msk.f32.vlgmr.msrb.gmra.mxu0 %vm181_vm2, %v233_v46  ;;  %v494_v46 = vld [vmem:[%s1376_s15 + $0x48] sm:$0xff] }
 0x2c4   :  { %507 = vmatpush.msra.mxu0 %v494_v46 }
 0x2c8   :  { %v235_v47 = vpop.f32.mrf.mxu1 }
 0x2c9   :  { %v236_v48 = vadd.f32 %v878_v40, %v235_v47 }
 0x2cb   :  { %834 = vmatmul.msk.f32.gmra.mxu0 %vm181_vm2, %v236_v48  ;;  %v439_v48 = vld [vmem:[%s1374_s13 + $0x40] sm:$0xff] }
 0x340   :  { %v269_v50 = vpop.f32.mrf.mxu0 }
 0x341   :  { %v270_v51 = vadd.f32 %v866_v49, %v269_v50 }
 0x343   :  { %v275_v52 = vmul.f32 %v270_v51, %v139_v19 }
 0x345   :  { %879 = vtanh.f32 %v275_v52  ;;  %v438_v52 = vld [vmem:[%s1374_s13 + $0x38] sm:$0xff] }
 0x348   :  { %v272_v53 = vpop.f32.mrf.mxu0 }
 0x349   :  { %v273_v54 = vadd.f32 %v866_v49, %v272_v53  ;;  %v493_v49 = vld [vmem:[%s1376_s15 + $0x40] sm:$0xff]  ;;  %v492_v53 = vld [vmem:[%s1376_s15 + $0x38] sm:$0xff] }
 0x34a   :  { %508 = vmatpush.msra.mxu0 %v493_v49 }
 0x34b   :  { %v880_v55 = vpop.eup %879  ;;  %v276_v56 = vmul.f32 %v273_v54, %v1079_v13  ;;  %v346_v13 = vpop.permute.xlu1 %345 }
 0x34c   :  { %353 = vrot.lane.b32.xlu2 %v880_v55, %s935_s7  ;;  %v367_v18 = vsel %vm181_vm2, %v1094_v25, %v346_v13  ;;  %509 = vmatpush.msra.mxu0 %v492_v53  ;;  %v1284_v53 = vld [vmem:[%s1377_s16 + $0x8] sm:$0xff] }
 0x34d   :  { %881 = vtanh.f32 %v276_v56  ;;  %v437_v56 = vld [vmem:[%s1374_s13 + $0x30] sm:$0xff]  ;;  %vm527_vm12 = vcmp.gt.f32.partialorder %v1284_v53, 0.0 }
 0x353   :  { %v882_v57 = vpop.eup %881  ;;  %v348_v16 = vpop.permute.xlu1 %347 }
 0x354   :  { %293 = vmatpush.msrb.mxu2 %v882_v57  ;;  %355 = vrot.lane.b32.xlu2 %v882_v57, %s935_s7  ;;  %v368_v21 = vsel %vm181_vm2, %v1091_v24, %v348_v16  ;;  %v443_v24 = vld [vmem:[%s1374_s13 + $0x60] sm:$0x1]  ;;  %s938_s7 = smov 80  }
 0x355   :  { %839 = vmatpush.msk.msra.mxu1 %vm450_vm6, %v443_v24 }
 0x356   :  { %294 = vmatpush.msrb.mxu2 %v880_v55 }
 0x357   :  { %835 = vmatmul.msk.f32.vlgmr.msrb.gmra.mxu2 %vm71_vm0, %v1053_v3  ;;  %458 = vmatpush.msra.mxu1 %v442_v38 }
 0x359   :  { %459 = vmatpush.msra.mxu1 %v441_v42 }
 0x35b   :  { %460 = vmatpush.msra.mxu1 %v440_v45 }
 0x35d   :  { %461 = vmatpush.msra.mxu1 %v439_v48 }
 0x35f   :  { %836 = vmatmul.msk.f32.gmra.mxu2 %vm71_vm0, %v1060_v4  ;;  %462 = vmatpush.msra.mxu1 %v438_v52  ;;  %v1279_v52 = vld [vmem:[%s1377_s16] sm:$0xff] }
 0x360   :  { %vm526_vm11 = vcmp.gt.f32.partialorder %v1279_v52, 0.0 }
 0x361   :  { %463 = vmatpush.msra.mxu1 %v437_v56 }
 0x363   :  { %464 = vmatpush.msra.mxu1 %v436_v61 }
 0x3a6   :  { %v354_v14 = vpop.permute.xlu2 %353 }
 0x3a7   :  { %v370_v19 = vsel %vm369_vm3, %v367_v18, %v354_v14  ;;  %v431_v14 = vld [vmem:[%s1374_s13] sm:$0xff] }
 0x3da   :  { %v296_v62 = vpop.f32.mrf.mxu2 }
 0x3db   :  { %v297_v63 = vadd.f32 %v880_v55, %v296_v62  ;;  %v490_v62 = vld [vmem:[%s1376_s15 + $0x28] sm:$0xff] }
 0x3dd   :  { %837 = vmatmul.msk.f32.vlgmr.msrb.gmra.mxu3 %vm181_vm2, %v297_v63 }
 0x3e2   :  { %v299_v0 = vpop.f32.mrf.mxu2 }
 0x3e3   :  { %v300_v1 = vadd.f32 %v882_v57, %v299_v0  ;;  %v491_v57 = vld [vmem:[%s1376_s15 + $0x30] sm:$0xff]  ;;  %v435_v0 = vld [vmem:[%s1374_s13 + $0x20] sm:$0xff] }
 0x3e4   :  { %510 = vmatpush.msra.mxu0 %v491_v57  ;;  %465 = vmatpush.msra.mxu1 %v435_v0 }
 0x3e5   :  { %838 = vmatmul.msk.f32.gmra.mxu3 %vm181_vm2, %v300_v1  ;;  %v489_v1 = vld [vmem:[%s1376_s15 + $0x20] sm:$0xff] }
 0x3e6   :  { %511 = vmatpush.msra.mxu0 %v490_v62 }
 0x3e8   :  { %512 = vmatpush.msra.mxu0 %v489_v1 }
 0x460   :  { %v333_v3 = vpop.f32.mrf.mxu3 }
 0x461   :  { %v334_v4 = vadd.f32 %v867_v2, %v333_v3  ;;  %v434_v3 = vld [vmem:[%s1374_s13 + $0x18] sm:$0xff] }
 0x462   :  { %466 = vmatpush.msra.mxu1 %v434_v3 }
 0x463   :  { %v339_v5 = vmul.f32 %v334_v4, %v1076_v8  ;;  %v488_v4 = vld [vmem:[%s1376_s15 + $0x18] sm:$0xff] }
 0x464   :  { %513 = vmatpush.msra.mxu0 %v488_v4 }
 0x465   :  { %883 = vtanh.f32 %v339_v5 }
 0x468   :  { %v336_v7 = vpop.f32.mrf.mxu3 }
 0x469   :  { %v337_v9 = vadd.f32 %v867_v2, %v336_v7  ;;  %v433_v7 = vld [vmem:[%s1374_s13 + $0x10] sm:$0xff] }
 0x46a   :  { %467 = vmatpush.msra.mxu1 %v433_v7 }
 0x46b   :  { %v884_v10 = vpop.eup %883  ;;  %v340_v11 = vmul.f32 %v337_v9, %v1070_v6  ;;  %v356_v6 = vpop.permute.xlu2 %355  ;;  %v487_v9 = vld [vmem:[%s1376_s15 + $0x10] sm:$0xff] }
 0x46c   :  { %361 = vrot.lane.b32.xlu0 %v884_v10, %s936_s9  ;;  %v371_v23 = vsel %vm369_vm3, %v368_v21, %v356_v6  ;;  %514 = vmatpush.msra.mxu0 %v487_v9 }
 0x46d   :  { %885 = vtanh.f32 %v340_v11  ;;  %v432_v11 = vld [vmem:[%s1374_s13 + $0x8] sm:$0xff] }
 0x46e   :  { %887 = vrcp.f32 %v937_v15  ;;  %468 = vmatpush.msra.mxu1 %v432_v11  ;;  %v485_v15 = vld [vmem:[%s1376_s15] sm:$0xff] }
 0x470   :  { %469 = vmatpush.msra.mxu1 %v431_v14 }
 0x473   :  { %v886_v12 = vpop.eup %885 }
 0x474   :  { %363 = vrot.lane.b32.xlu1 %v886_v12, %s936_s9  ;;  %v888_v17 = vpop.eup %887  ;;  %v486_v12 = vld [vmem:[%s1376_s15 + $0x8] sm:$0xff] }
 0x475   :  { %v386_v20 = vmul.f32 16.0, %v888_v17  ;;  %vm390_vm7 = vweird.f32 %v888_v17  ;;  %515 = vmatpush.msra.mxu0 %v486_v12 }
 0x477   :  { %v387_v29 = vsub.f32 1.0, %v386_v20  ;;  %516 = vmatpush.msra.mxu0 %v485_v15 }
 0x479   :  { %v388_v33 = vmul.f32 %v888_v17, %v387_v29 }
 0x47b   :  { %v389_v35 = vadd.f32 %v888_v17, %v388_v33 }
 0x47d   :  { %v391_v41 = vsel %vm390_vm7, %v888_v17, %v389_v35  ;;  %v869_v35 = vld [vmem:[%s1375_s14] ss:$0 sm:$0xff]  ;;  %s939_s14 = smov 48  }
 0x4de   :  { %v362_v8 = vpop.permute.xlu0 %361 }
 0x4df   :  { %v373_v22 = vsel %vm372_vm4, %v370_v19, %v362_v8 }
 0x4e0   :  { %v376_v28 = vsel %vm375_vm5, %v373_v22, 0.0 }
 0x4e6   :  { %v364_v26 = vpop.permute.xlu1 %363 }
 0x4e7   :  { %v374_v27 = vsel %vm372_vm4, %v371_v23, %v364_v26 }
 0x4e8   :  { %v377_v30 = vsel %vm375_vm5, %v374_v27, 0.0 }
 0x4e9   :  { %v378_v31 = vadd.f32 %v377_v30, %v376_v28  ;;  %v868_v28 = vld [vmem:[%s1373_s12] ss:$0 sm:$0xff] }
 0x4eb   :  { %v379_v32 = vrot.slane %v378_v31, 4 }
 0x4ed   :  { %v380_v25 = vadd.f32 %v379_v32, %v378_v31 }
 0x4ef   :  { %v381_v34 = vrot.slane %v380_v25, 2 }
 0x4f1   :  { %v382_v37 = vadd.f32 %v381_v34, %v380_v25 }
 0x4f3   :  { %v383_v40 = vrot.slane %v382_v37, 1 }
 0x4f5   :  { %v384_v44 = vadd.f32 %v383_v40, %v382_v37 }
 0x4f7   :  { %v392_v47 = vmul.f32 %v391_v41, %v384_v44 }
 0x4f9   :  { %v1197_v50 = vsub.f32 %v373_v22, %v392_v47  ;;  %v1199_v51 = vsub.f32 %v374_v27, %v392_v47  ;;  %v407_v22 = vld [vmem:[%s1372_s11] sm:$0x1] }
 0x4fb   :  { %v395_v54 = vmul.f32 %v1197_v50, %v1197_v50  ;;  %v396_v55 = vmul.f32 %v1199_v51, %v1199_v51 }
 0x4fd   :  { %v397_v58 = vsel %vm375_vm5, %v395_v54, 0.0  ;;  %v398_v59 = vsel %vm375_vm5, %v396_v55, 0.0 }
 0x4fe   :  { %v399_v60 = vadd.f32 %v398_v59, %v397_v58 }
 0x500   :  { %v400_v63 = vrot.slane %v399_v60, 4 }
 0x502   :  { %v401_v2 = vadd.f32 %v400_v63, %v399_v60 }
 0x504   :  { %v402_v5 = vrot.slane %v401_v2, 2 }
 0x506   :  { %v403_v10 = vadd.f32 %v402_v5, %v401_v2 }
 0x508   :  { %v404_v13 = vrot.slane %v403_v10, 1 }
 0x50a   :  { %v405_v16 = vadd.f32 %v404_v13, %v403_v10 }
 0x50c   :  { %v406_v17 = vmul.f32 %v405_v16, %v391_v41 }
 0x50e   :  { %v408_v8 = vadd.f32 1e-05, %v406_v17 }
 0x510   :  { %889 = vrsqrt.f32 %v408_v8  ;;  %vm415_vm9 = vweird.f32 %v408_v8 }
 0x516   :  { %v890_v18 = vpop.eup %889 }
 0x517   :  { %v410_v6 = vmul.f32 %v890_v18, %v408_v8  ;;  %vm416_vm8 = vweird.f32 %v890_v18 }
 0x518   :  { %vm417_vm10 = vmor %vm415_vm9, %vm416_vm8 }
 0x519   :  { %v411_v19 = vmul.f32 %v890_v18, %v410_v6 }
 0x51b   :  { %v412_v20 = vmul.f32 0.5, %v411_v19 }
 0x51d   :  { %v413_v21 = vsub.f32 1.5, %v412_v20 }
 0x51f   :  { %v414_v23 = vmul.f32 %v890_v18, %v413_v21 }
 0x521   :  { %v418_v26 = vsel %vm417_vm10, %v890_v18, %v414_v23 }
 0x522   :  { %v419_v27 = vmul.f32 %v418_v26, %v407_v22 }
 0x524   :  { %v421_v29 = vperm.slane %v419_v27, 0 }
 0x526   :  { %v423_v30 = vmul.f32 %v421_v29, %v1197_v50  ;;  %v424_v32 = vmul.f32 %v421_v29, %v1199_v51 }
 0x528   :  { %v429_v31 = vadd.f32 %v868_v28, %v423_v30  ;;  %v430_v33 = vadd.f32 %v868_v28, %v424_v32 }
 0x52a   :  { %840 = vmatmul.msk.f32.vlgmr.msra.gmra.mxu1 %vm375_vm5, %v429_v31  ;;  %843 = vmatmul.msk.f32.vlgmr.msra.gmra.mxu0 %vm375_vm5, %v429_v31 }
 0x532   :  { %841 = vmatmul.msk.f32.gmra.mxu1 %vm375_vm5, %v430_v33  ;;  %844 = vmatmul.msk.f32.gmra.mxu0 %vm375_vm5, %v430_v33 }
 0x5a7   :  { %v471_v25 = vpop.f32.mrf.mxu1  ;;  %v518_v34 = vpop.f32.mrf.mxu0 }
 0x5a8   :  { %891 = vtanh.f32 %v471_v25 }
 0x5ae   :  { %v892_v24 = vpop.eup %891 }
 0x5af   :  { %v474_v36 = vpop.f32.mrf.mxu1  ;;  %v521_v37 = vpop.f32.mrf.mxu0  ;;  %v483_v38 = vmul.f32 %v892_v24, %v869_v35 }
 0x5b0   :  { %893 = vtanh.f32 %v474_v36  ;;  %628 = vmatpush.msra.mxu3 %v521_v37  ;;  %v859_v42 = vpack.i.bf16 %v518_v34, %v521_v37 }
 0x5b1   :  { %636 = vrot.lane.b32.xlu2 %v483_v38, %s936_s9  ;;  %v528_v39 = vsel %vm181_vm2, %v483_v38, 0.0 }
 0x5b2   :  { %629 = vmatpush.msra.mxu3 %v518_v34  ;;  %529 = vadd.xlane.f32.xlu1 %v528_v39 }
 0x5b6   :  { %v894_v40 = vpop.eup %893 }
 0x5b7   :  { %v484_v41 = vmul.f32 %v894_v40, %v869_v35 }
 0x5b9   :  { %638 = vrot.lane.b32.xlu0 %v484_v41, %s936_s9  ;;  %v531_v43 = vsel %vm181_vm2, %v484_v41, 0.0 }
 0x5cb   :  { %860 = vrot.lane.b32.xlu1 %v859_v42, %s938_s7 }
 0x5da   :  { %532 = vadd.xlane.f32.xlu2 %v531_v43 }
 0x60b   :  { %v637_v44 = vpop.permute.xlu2 %636 }
 0x60c   :  { %v642_v45 = vsel %vm181_vm2, %v637_v44, 0.0 }
 0x60d   :  { %643 = vadd.xlane.f32.xlu0 %v642_v45 }
 0x625   :  { %v530_v48 = vpop.xlane.xlu1 %529 }
 0x626   :  { %v534_v54 = vsel %vm526_vm11, %v530_v48, -1e+30 }
 0x627   :  { %v537_v57 = vsel %vm536_vm13, %v534_v54, -inf }
 0x62b   :  { %v639_v46 = vpop.permute.xlu0 %638 }
 0x62c   :  { %v645_v47 = vsel %vm181_vm2, %v639_v46, 0.0 }
 0x62d   :  { %646 = vadd.xlane.f32.xlu2 %v645_v47 }
 0x63d   :  { %v861_v49 = vpop.permute.xlu1 %860 }
 0x63e   :  { %v862_v50 = vunpack.i.l.bf16 %v861_v49  ;;  %v863_v51 = vunpack.i.h.bf16 %v861_v49 }
 0x640   :  { %749 = vmatpush.msrb.mxu3 %v862_v50 }
 0x642   :  { %750 = vmatpush.msrb.mxu3 %v863_v51 }
 0x64d   :  { %v533_v55 = vpop.xlane.xlu2 %532 }
 0x64e   :  { %v535_v56 = vsel %vm527_vm12, %v533_v55, -1e+30 }
 0x64f   :  { %v538_v58 = vsel %vm536_vm13, %v535_v56, -inf }
 0x650   :  { %v539_v59 = vmax.f32 %v537_v57, %v538_v58 }
 0x652   :  { %v540_v60 = vrot.slane %v539_v59, 4 }
 0x654   :  { %v541_v61 = vmax.f32 %v539_v59, %v540_v60 }
 0x656   :  { %v542_v62 = vrot.slane %v541_v61, 2 }
 0x658   :  { %v543_v63 = vmax.f32 %v541_v61, %v542_v62 }
 0x65a   :  { %v544_v0 = vrot.slane %v543_v63, 1 }
 0x65c   :  { %v545_v1 = vmax.f32 %v543_v63, %v544_v0 }
 0x65e   :  { %v546_v2 = vsub.f32 %v530_v48, %v545_v1  ;;  %v547_v3 = vsub.f32 %v533_v55, %v545_v1 }
 0x660   :  { %v548_v4 = vmul.f32 1.442695, %v546_v2  ;;  %v550_v5 = vmul.f32 1.442695, %v547_v3 }
 0x662   :  { %895 = vpow2.f32 %v548_v4 }
 0x663   :  { %897 = vpow2.f32 %v550_v5 }
 0x668   :  { %v896_v7 = vpop.eup %895 }
 0x669   :  { %v898_v9 = vpop.eup %897  ;;  %v552_v10 = vsel %vm526_vm11, %v896_v7, 0.0 }
 0x66a   :  { %v553_v11 = vsel %vm527_vm12, %v898_v9, 0.0  ;;  %v554_v12 = vsel %vm536_vm13, %v552_v10, 0.0 }
 0x66b   :  { %v555_v13 = vsel %vm536_vm13, %v553_v11, 0.0 }
 0x66c   :  { %v556_v14 = vadd.f32 %v555_v13, %v554_v12  ;;  %v773_v13 = vld [vmem:[%s1378_s17 + $0x60] sm:$0x1] }
 0x66d   :  { %847 = vmatpush.msk.msra.mxu2 %vm450_vm6, %v773_v13  ;;  %vm805_vm6 = vcmask 123904  }
 0x66e   :  { %v557_v15 = vrot.slane %v556_v14, 4 }
 0x670   :  { %v558_v16 = vadd.f32 %v557_v15, %v556_v14  ;;  %v772_v14 = vld [vmem:[%s1378_s17 + $0x58] sm:$0xff]  ;;  %v771_v15 = vld [vmem:[%s1378_s17 + $0x50] sm:$0xff] }
 0x671   :  { %788 = vmatpush.msra.mxu2 %v772_v14 }
 0x672   :  { %v559_v17 = vrot.slane %v558_v16, 2 }
 0x673   :  { %789 = vmatpush.msra.mxu2 %v771_v15 }
 0x674   :  { %v560_v8 = vadd.f32 %v559_v17, %v558_v16  ;;  %v770_v16 = vld [vmem:[%s1378_s17 + $0x48] sm:$0xff]  ;;  %v769_v17 = vld [vmem:[%s1378_s17 + $0x40] sm:$0xff] }
 0x675   :  { %790 = vmatpush.msra.mxu2 %v770_v16 }
 0x676   :  { %v561_v18 = vrot.slane %v560_v8, 1 }
 0x677   :  { %791 = vmatpush.msra.mxu2 %v769_v17 }
 0x678   :  { %v562_v6 = vadd.f32 %v561_v18, %v560_v8  ;;  %v768_v8 = vld [vmem:[%s1378_s17 + $0x38] sm:$0xff]  ;;  %v767_v18 = vld [vmem:[%s1378_s17 + $0x30] sm:$0xff] }
 0x679   :  { %792 = vmatpush.msra.mxu2 %v768_v8 }
 0x67a   :  { %899 = vrcp.f32 %v562_v6  ;;  %v574_v22 = vand.u32 2147483648, %v562_v6  ;;  %v572_v26 = vand.u32 2147483647, %v562_v6  ;;  %vm568_vm15 = vweird.f32 %v562_v6 }
 0x67b   :  { %793 = vmatpush.msra.mxu2 %v767_v18 }
 0x67c   :  { %v575_v28 = vor.u32 1.1754944e-38, %v574_v22  ;;  %vm573_vm2 = vcmp.eq.f32.partialorder %v572_v26, 8.507059e+37  ;;  %v762_v22 = vld [vmem:[%s1378_s17 + $0x8] sm:$0xff] }
 0x680   :  { %v900_v19 = vpop.eup %899  ;;  %v644_v33 = vpop.xlane.xlu0 %643 }
 0x681   :  { %v564_v20 = vmul.f32 %v900_v19, %v562_v6  ;;  %vm569_vm14 = vweird.f32 %v900_v19  ;;  %v648_v25 = vsel %vm526_vm11, %v644_v33, -1e+30  ;;  %v766_v6 = vld [vmem:[%s1378_s17 + $0x28] sm:$0xff] }
 0x682   :  { %vm570_vm1 = vmor %vm568_vm15, %vm569_vm14  ;;  %v650_v24 = vsel %vm536_vm13, %v648_v25, -inf  ;;  %794 = vmatpush.msra.mxu2 %v766_v6 }
 0x683   :  { %v565_v21 = vsub.f32 1.0, %v564_v20  ;;  %v764_v20 = vld [vmem:[%s1378_s17 + $0x18] sm:$0xff] }
 0x685   :  { %v566_v23 = vmul.f32 %v900_v19, %v565_v21  ;;  %v763_v21 = vld [vmem:[%s1378_s17 + $0x10] sm:$0xff] }
 0x687   :  { %v567_v27 = vadd.f32 %v900_v19, %v566_v23 }
 0x689   :  { %v571_v29 = vsel %vm570_vm1, %v900_v19, %v567_v27  ;;  %v765_v19 = vld [vmem:[%s1378_s17 + $0x20] sm:$0xff] }
 0x68a   :  { %v576_v30 = vsel %vm573_vm2, %v575_v28, %v571_v29  ;;  %795 = vmatpush.msra.mxu2 %v765_v19  ;;  %v761_v27 = vld [vmem:[%s1378_s17] sm:$0xff] }
 0x68b   :  { %v577_v31 = vmul.f32 %v576_v30, %v552_v10  ;;  %v578_v32 = vmul.f32 %v576_v30, %v553_v11  ;;  %v870_v30 = vld [vmem:[%s1379_s18] ss:$0 sm:$0xff] }
 0x68c   :  { %796 = vmatpush.msra.mxu2 %v764_v20 }
 0x68d   :  { %579 = vxpose.xlu2.b32.start [1/2] (short) (narrow) %v577_v31, 8 }
 0x68e   :  { %797 = vmatpush.msra.mxu2 %v763_v21 }
 0x690   :  { %798 = vmatpush.msra.mxu2 %v762_v22 }
 0x692   :  { %799 = vmatpush.msra.mxu2 %v761_v27 }
 0x695   :  { %580 = vxpose.xlu2.b32.end [2/2] (short) (narrow) %v578_v32, 8 }
 0x6a0   :  { %v647_v34 = vpop.xlane.xlu2 %646 }
 0x6a1   :  { %v649_v35 = vsel %vm527_vm12, %v647_v34, -1e+30 }
 0x6a2   :  { %v651_v36 = vsel %vm536_vm13, %v649_v35, -inf }
 0x6a3   :  { %v652_v37 = vmax.f32 %v650_v24, %v651_v36 }
 0x6a5   :  { %v653_v38 = vrot.slane %v652_v37, 4 }
 0x6a7   :  { %v654_v39 = vmax.f32 %v652_v37, %v653_v38 }
 0x6a9   :  { %v655_v40 = vrot.slane %v654_v39, 2 }
 0x6ab   :  { %v656_v41 = vmax.f32 %v654_v39, %v655_v40 }
 0x6ad   :  { %v657_v42 = vrot.slane %v656_v41, 1 }
 0x6af   :  { %v658_v43 = vmax.f32 %v656_v41, %v657_v42 }
 0x6b1   :  { %v659_v44 = vsub.f32 %v644_v33, %v658_v43  ;;  %v660_v45 = vsub.f32 %v647_v34, %v658_v43 }
 0x6b3   :  { %v661_v46 = vmul.f32 1.442695, %v659_v44  ;;  %v663_v47 = vmul.f32 1.442695, %v660_v45 }
 0x6b5   :  { %901 = vpow2.f32 %v661_v46 }
 0x6b6   :  { %903 = vpow2.f32 %v663_v47 }
 0x6bb   :  { %v902_v48 = vpop.eup %901 }
 0x6bc   :  { %v904_v49 = vpop.eup %903  ;;  %v665_v50 = vsel %vm526_vm11, %v902_v48, 0.0 }
 0x6bd   :  { %v666_v51 = vsel %vm527_vm12, %v904_v49, 0.0  ;;  %v667_v54 = vsel %vm536_vm13, %v665_v50, 0.0 }
 0x6be   :  { %v668_v55 = vsel %vm536_vm13, %v666_v51, 0.0 }
 0x6bf   :  { %v669_v56 = vadd.f32 %v668_v55, %v667_v54 }
 0x6c1   :  { %v670_v57 = vrot.slane %v669_v56, 4 }
 0x6c3   :  { %v671_v58 = vadd.f32 %v670_v57, %v669_v56 }
 0x6c5   :  { %v672_v59 = vrot.slane %v671_v58, 2 }
 0x6c7   :  { %v673_v60 = vadd.f32 %v672_v59, %v671_v58 }
 0x6c9   :  { %v674_v61 = vrot.slane %v673_v60, 1 }
 0x6cb   :  { %v675_v62 = vadd.f32 %v674_v61, %v673_v60 }
 0x6cd   :  { %905 = vrcp.f32 %v675_v62  ;;  %v687_v52 = vand.u32 2147483648, %v675_v62  ;;  %v685_v53 = vand.u32 2147483647, %v675_v62  ;;  %vm681_vm4 = vweird.f32 %v675_v62 }
 0x6cf   :  { %v688_v4 = vor.u32 1.1754944e-38, %v687_v52  ;;  %vm686_vm8 = vcmp.eq.f32.partialorder %v685_v53, 8.507059e+37 }
 0x6d3   :  { %v906_v63 = vpop.eup %905 }
 0x6d4   :  { %v677_v0 = vmul.f32 %v906_v63, %v675_v62  ;;  %vm682_vm3 = vweird.f32 %v906_v63 }
 0x6d5   :  { %vm683_vm7 = vmor %vm681_vm4, %vm682_vm3 }
 0x6d6   :  { %v678_v1 = vsub.f32 1.0, %v677_v0 }
 0x6d8   :  { %v679_v2 = vmul.f32 %v906_v63, %v678_v1 }
 0x6da   :  { %v680_v3 = vadd.f32 %v906_v63, %v679_v2 }
 0x6dc   :  { %v684_v5 = vsel %vm683_vm7, %v906_v63, %v680_v3 }
 0x6dd   :  { %v689_v7 = vsel %vm686_vm8, %v688_v4, %v684_v5 }
 0x6de   :  { %v690_v9 = vmul.f32 %v689_v7, %v665_v50  ;;  %v691_v10 = vmul.f32 %v689_v7, %v666_v51 }
 0x6e0   :  { %692 = vxpose.xlu0.b32.start [1/2] (short) (narrow) %v690_v9, 8 }
 0x6e8   :  { %693 = vxpose.xlu0.b32.end [2/2] (short) (narrow) %v691_v10, 8 }
 0x726   :  { %v595_v11 = vpop.trf.xlu2 }
 0x727   :  { %845 = vmatmul.msk.f32.vlgmr.msra.gmra.mxu3 %vm71_vm0, %v595_v11 }
 0x784   :  { %v708_v12 = vpop.trf.xlu0 }
 0x785   :  { %846 = vmatmul.msk.f32.vlgmr.msrb.gmra.mxu3 %vm71_vm0, %v708_v12  ;;  %vm759_vm0 = vcmask 392192  }
 0x7aa   :  { %v631_v23 = vpop.f32.mrf.mxu3 }
 0x808   :  { %v752_v26 = vpop.f32.mrf.mxu3 }
 0x809   :  { %756 = vrot.lane.b32.xlu1 %v752_v26, %s939_s14 }
 0x87b   :  { %v757_v28 = vpop.permute.xlu1 %756 }
 0x87c   :  { %v760_v29 = vsel %vm759_vm0, %v631_v23, %v757_v28 }
 0x87d   :  { %848 = vmatmul.msk.f32.vlgmr.msra.gmra.mxu2 %vm375_vm5, %v760_v29 }
 0x900   :  { %v801_v31 = vpop.f32.mrf.mxu2 }
 0x901   :  { %v802_v32 = vadd.f32 %v870_v30, %v801_v31 }
 0x903   :  { %v804_v33 = vmax.f32 %v802_v32, 0.0 }
 0x905   :  { %806 = vst.msk [vmem:[#allocation3] sm:$0x3] %vm805_vm6, %v804_v33 }
 0x906   :  { %817 = dma.vmem_to_hbm [thread:$0]  %s813_s4, 32, %s815_s26, [#allocation4]  }
 0x907   :  { %931 = dma.done.wait [#allocation4], 32  }
 0x908   :  { %932 = vsyncadd [#allocation4], 4294967264 }
 0x909   :  { %822 = vsyncpa [#allocation4], 1 }

</bundles_post_ra>
